<compile_context>
chip_gen: v7x
topology: tpu7x:2x2x1
jax: 0.10.0
libtpu: 0.0.40
codegen_flags: <defaults>
</compile_context>

<pallas_src>
import functools

import jax
import jax.numpy as jnp
from jax.experimental import pallas as pl
from jax.experimental.pallas import tpu as pltpu


def _my_layernorm_kernel(x_ref, bd_ref, wb_ref, o_ref, *, eps, d):
    """One (batch-tile, head-tile) block.

    x_ref : (TB, L, THD)  lane-dense input slab (THD = TH * D)
    bd_ref: (THD, THD)    bf16 block-diagonal 0/1 matrix (1 inside each DxD block)
    wb_ref: (2, THD)      row 0 = LayerNorm weight, row 1 = bias (tiled over TH heads)
    o_ref : (TB, L, THD)  lane-dense output slab
    """
    tb, ell, thd = x_ref.shape
    x3 = x_ref[...].astype(jnp.float32)
    # Leading-dim merge: layout-free (never crosses the (8,128) tile for L % 8 == 0).
    x = x3.reshape(tb * ell, thd)

    bd = bd_ref[...]

    # Split-f32 operands: each dot is a native single-pass bf16 MXU matmul, but
    # hi + lo recovers ~f32 accuracy (the 0/1 entries of bd are exact in bf16).
    x_hi = x.astype(jnp.bfloat16)
    x_lo = (x - x_hi.astype(jnp.float32)).astype(jnp.bfloat16)
    sq = x * x
    sq_hi = sq.astype(jnp.bfloat16)
    sq_lo = (sq - sq_hi.astype(jnp.float32)).astype(jnp.bfloat16)

    # Four independent MXU dots issued back-to-back (no serial MXU dependency).
    sum_x = (jnp.dot(x_hi, bd, preferred_element_type=jnp.float32)
             + jnp.dot(x_lo, bd, preferred_element_type=jnp.float32))
    sum_sq = (jnp.dot(sq_hi, bd, preferred_element_type=jnp.float32)
              + jnp.dot(sq_lo, bd, preferred_element_type=jnp.float32))

    inv_d = 1.0 / d
    mean = sum_x * inv_d
    # Biased variance (matches torch.nn.LayerNorm); clamp guards the
    # E[x^2] - mean^2 cancellation for pathological (huge-mean) inputs.
    var = jnp.maximum(sum_sq * inv_d - mean * mean, 0.0)

    x_hat = (x - mean) * jax.lax.rsqrt(var + eps)

    wb = wb_ref[...].astype(jnp.float32)
    x_hat = x_hat * wb[0:1, :] + wb[1:2, :]

    # Seasonal bias: mean over L per batch element, broadcast back, subtract.
    x_hat3 = x_hat.reshape(tb, ell, thd)
    seasonal = jnp.mean(x_hat3, axis=1, keepdims=True)
    o_ref[...] = (x_hat3 - seasonal).astype(o_ref.dtype)


def _choose_head_tile(H, D):
    """Smallest TH with H % TH == 0 and (TH*D) % 128 == 0 (lane-dense, minimal THD)."""
    for th in range(1, H + 1):
        if H % th == 0 and (th * D) % 128 == 0:
            return th
    return H  # fallback: full extent (legal; stores become masked partial-lane writes)


def _vmem_capacity_bytes():
    try:
        cap = int(getattr(pltpu.get_tpu_info(), "vmem_capacity_bytes", 0))
        if cap > 0:
            return cap
    except Exception:
        pass
    return 64 * 1024 * 1024  # conservative fallback (v7x per-core VMEM)


def _block_working_set_bytes(tb, L, thd, itemsize):
    io = tb * L * thd * itemsize        # one input block == one output block
    f32_row = tb * L * thd * 4
    bd = thd * thd * 2
    # double-buffered in+out blocks + ~10 live f32/bf16 temporaries + bd buffers + params.
    return 4 * io + 10 * f32_row + 2 * bd + 4 * thd * 4


def _choose_batch_tile(B, L, thd, itemsize, budget, n_h):
    divisors = [tb for tb in range(1, B + 1) if B % tb == 0]
    fits = [tb for tb in divisors
            if _block_working_set_bytes(tb, L, thd, itemsize) <= budget]
    if not fits:
        fits = [1]
    # Keep >= 2 "parallel" grid steps when possible so both v7x TensorCores get work.
    multi = [tb for tb in fits if (B // tb) * n_h >= 2]
    pool = multi if multi else fits
    return max(pool)


def my_layernorm(x, weight, bias, *, eps=1e-5):
    """x: (B, L, H, D); weight/bias: (D,). Returns (B, L, H, D)."""
    B, L, H, D = x.shape
    itemsize = x.dtype.itemsize

    TH = _choose_head_tile(H, D)
    THD = TH * D
    n_h = H // TH

    # Generation-aware VMEM budgeting: ~3/8 of physical VMEM as block working set
    # (~48 MiB on 128-MiB v5e/v6e, ~24 MiB on 64-MiB v7x); cap the scoped limit at
    # 3/4 of physical to leave compiler-internal scratch headroom.
    cap = _vmem_capacity_bytes()
    budget = min(48 * 1024 * 1024, (cap * 3) // 8)
    limit_cap = (cap * 3) // 4

    TB = _choose_batch_tile(B, L, THD, itemsize, budget, n_h)
    n_b = B // TB

    # TODO(synk): for very large L where even a TB=1 slab exceeds the VMEM budget,
    # add an L grid axis ("arbitrary") with a two-pass / running-sum seasonal mean.

    # Lane-dense view: collapse (H, D) -> H*D (contiguous reshape, no HBM copy).
    x_flat = x.reshape(B, L, H * D)

    # Block-diagonal segmented-sum matrix: bd[i, j] = 1 iff i, j share a D-group.
    grp = jnp.arange(THD, dtype=jnp.int32) // D
    bd = (grp[:, None] == grp[None, :]).astype(jnp.bfloat16)

    # LayerNorm params tiled across the TH heads of one block; single tiny input.
    wb = jnp.stack([jnp.tile(weight.astype(jnp.float32), TH),
                    jnp.tile(bias.astype(jnp.float32), TH)], axis=0)

    needed = _block_working_set_bytes(TB, L, THD, itemsize) + (4 << 20)
    vmem_limit = int(min(limit_cap, max(needed, 16 << 20)))

    # Advisory cost for the XLA scheduler (memory-bound custom call).
    m_rows = TB * L
    n_blocks = n_b * n_h
    cost = pl.CostEstimate(
        flops=int(n_blocks * (8 * m_rows * THD * THD + 20 * m_rows * THD)),
        transcendentals=int(n_blocks * m_rows * THD),
        bytes_accessed=int(2 * B * L * H * D * itemsize + 2 * THD * THD + 8 * THD),
    )

    kernel = functools.partial(_my_layernorm_kernel, eps=eps, d=D)
    out_flat = pl.pallas_call(
        kernel,
        out_shape=jax.ShapeDtypeStruct((B, L, H * D), x.dtype),
        grid=(n_b, n_h),
        in_specs=[
            pl.BlockSpec((TB, L, THD), lambda b, h: (b, 0, h)),
            pl.BlockSpec((THD, THD), lambda b, h: (0, 0)),
            pl.BlockSpec((2, THD), lambda b, h: (0, 0)),
        ],
        out_specs=pl.BlockSpec((TB, L, THD), lambda b, h: (b, 0, h)),
        compiler_params=pltpu.CompilerParams(
            dimension_semantics=("parallel", "parallel"),
            vmem_limit_bytes=vmem_limit,
        ),
        cost_estimate=cost,
    )(x_flat, bd, wb)

    return out_flat.reshape(B, L, H, D)


def _reference(x, weight, bias, eps=1e-5):
    xf = x.astype(jnp.float32)
    mean = jnp.mean(xf, axis=-1, keepdims=True)
    var = jnp.mean((xf - mean) ** 2, axis=-1, keepdims=True)
    x_hat = (xf - mean) * jax.lax.rsqrt(var + eps)
    x_hat = x_hat * weight.astype(jnp.float32) + bias.astype(jnp.float32)
    seasonal = jnp.mean(x_hat, axis=1, keepdims=True)
    return (x_hat - seasonal).astype(x.dtype)


if __name__ == "__main__":
    key = jax.random.PRNGKey(0)
    kx, kw, kb = jax.random.split(key, 3)

    B, L, H, D = 2, 8, 4, 32  # channels = D = 32; H*D = 128 (lane dense)
    x = jax.random.normal(kx, (B, L, H, D), dtype=jnp.float32)
    # Learnable LayerNorm params (default init would be ones/zeros; use
    # non-trivial values to exercise the affine path).
    weight = 1.0 + 0.1 * jax.random.normal(kw, (D,), dtype=jnp.float32)
    bias = 0.1 * jax.random.normal(kb, (D,), dtype=jnp.float32)

    out = my_layernorm(x, weight, bias)
    out = jax.block_until_ready(out)

    ref = _reference(x, weight, bias)
    assert out.shape == (B, L, H, D)
    err = float(jnp.max(jnp.abs(out - ref)))
    assert jnp.allclose(out, ref, atol=1e-4, rtol=1e-4), "max abs err = %f" % err

    print("KERNEL_OK")
</pallas_src>

<mosaic_0001>
module attributes {stable_mosaic.version = 11 : i64} {
  func.func @_my_layernorm_kernel(%arg0: i32, %arg1: i32, %arg2: memref<1x8x128xf32, #tpu.memory_space<vmem>>, %arg3: memref<128x128xbf16, #tpu.memory_space<vmem>>, %arg4: memref<2x128xf32, #tpu.memory_space<vmem>>, %arg5: memref<1x8x128xf32, #tpu.memory_space<vmem>>) attributes {dimension_semantics = [#tpu.dimension_semantics<parallel>, #tpu.dimension_semantics<parallel>], iteration_bounds = array<i64: 2, 1>, scalar_prefetch = 0 : i64, scratch_operands = 0 : i64, tpu.core_type = #tpu.core_type<tc>, window_params = [{transform_indices = @transform_0, window_bounds = array<i64: 1, 8, 128>}, {pipeline_mode = #tpu.pipeline_mode<synchronous>, transform_indices = @transform_1, window_bounds = array<i64: 128, 128>}, {pipeline_mode = #tpu.pipeline_mode<synchronous>, transform_indices = @transform_2, window_bounds = array<i64: 2, 128>}, {transform_indices = @transform_3, window_bounds = array<i64: 1, 8, 128>}]} {
    %c0 = arith.constant 0 : index
    %c0_0 = arith.constant 0 : index
    %c0_1 = arith.constant 0 : index
    %0 = vector.load %arg2[%c0, %c0_0, %c0_1] : memref<1x8x128xf32, #tpu.memory_space<vmem>>, vector<1x8x128xf32>
    %1 = vector.shape_cast %0 : vector<1x8x128xf32> to vector<8x128xf32>
    %c0_2 = arith.constant 0 : index
    %c0_3 = arith.constant 0 : index
    %2 = vector.load %arg3[%c0_2, %c0_3] : memref<128x128xbf16, #tpu.memory_space<vmem>>, vector<128x128xbf16>
    %3 = arith.truncf %1 : vector<8x128xf32> to vector<8x128xbf16>
    %4 = arith.extf %3 : vector<8x128xbf16> to vector<8x128xf32>
    %5 = arith.subf %1, %4 : vector<8x128xf32>
    %6 = arith.truncf %5 : vector<8x128xf32> to vector<8x128xbf16>
    %7 = arith.mulf %1, %1 : vector<8x128xf32>
    %8 = arith.truncf %7 : vector<8x128xf32> to vector<8x128xbf16>
    %9 = arith.extf %8 : vector<8x128xbf16> to vector<8x128xf32>
    %10 = arith.subf %7, %9 : vector<8x128xf32>
    %11 = arith.truncf %10 : vector<8x128xf32> to vector<8x128xbf16>
    %cst = arith.constant dense<0.000000e+00> : vector<8x128xf32>
    %12 = tpu.matmul %3, %2, %cst {dimension_numbers = #tpu.dot_dimension_numbers<[1], [0], [0], [1], [0, 0, 1, 1], [], []>} : vector<8x128xbf16>, vector<128x128xbf16>, vector<8x128xf32> -> vector<8x128xf32>
    %cst_4 = arith.constant dense<0.000000e+00> : vector<8x128xf32>
    %13 = tpu.matmul %6, %2, %cst_4 {dimension_numbers = #tpu.dot_dimension_numbers<[1], [0], [0], [1], [0, 0, 1, 1], [], []>} : vector<8x128xbf16>, vector<128x128xbf16>, vector<8x128xf32> -> vector<8x128xf32>
    %14 = arith.addf %12, %13 : vector<8x128xf32>
    %cst_5 = arith.constant dense<0.000000e+00> : vector<8x128xf32>
    %15 = tpu.matmul %8, %2, %cst_5 {dimension_numbers = #tpu.dot_dimension_numbers<[1], [0], [0], [1], [0, 0, 1, 1], [], []>} : vector<8x128xbf16>, vector<128x128xbf16>, vector<8x128xf32> -> vector<8x128xf32>
    %cst_6 = arith.constant dense<0.000000e+00> : vector<8x128xf32>
    %16 = tpu.matmul %11, %2, %cst_6 {dimension_numbers = #tpu.dot_dimension_numbers<[1], [0], [0], [1], [0, 0, 1, 1], [], []>} : vector<8x128xbf16>, vector<128x128xbf16>, vector<8x128xf32> -> vector<8x128xf32>
    %17 = arith.addf %15, %16 : vector<8x128xf32>
    %cst_7 = arith.constant 3.125000e-02 : f32
    %18 = vector.broadcast %cst_7 : f32 to vector<8x128xf32>
    %19 = arith.mulf %14, %18 : vector<8x128xf32>
    %cst_8 = arith.constant 3.125000e-02 : f32
    %20 = vector.broadcast %cst_8 : f32 to vector<8x128xf32>
    %21 = arith.mulf %17, %20 : vector<8x128xf32>
    %22 = arith.mulf %19, %19 : vector<8x128xf32>
    %23 = arith.subf %21, %22 : vector<8x128xf32>
    %cst_9 = arith.constant 0.000000e+00 : f32
    %24 = vector.broadcast %cst_9 : f32 to vector<8x128xf32>
    %25 = arith.maximumf %23, %24 : vector<8x128xf32>
    %26 = arith.subf %1, %19 : vector<8x128xf32>
    %cst_10 = arith.constant 9.99999974E-6 : f32
    %27 = vector.broadcast %cst_10 : f32 to vector<8x128xf32>
    %28 = arith.addf %25, %27 : vector<8x128xf32>
    %29 = math.rsqrt %28 : vector<8x128xf32>
    %30 = arith.mulf %26, %29 : vector<8x128xf32>
    %c0_11 = arith.constant 0 : index
    %c0_12 = arith.constant 0 : index
    %31 = vector.load %arg4[%c0_11, %c0_12] : memref<2x128xf32, #tpu.memory_space<vmem>>, vector<2x128xf32>
    %32 = vector.extract_strided_slice %31 {offsets = [0, 0], sizes = [1, 128], strides = [1, 1]} : vector<2x128xf32> to vector<1x128xf32>
    %33 = vector.broadcast %32 : vector<1x128xf32> to vector<8x128xf32>
    %34 = arith.mulf %30, %33 : vector<8x128xf32>
    %35 = vector.extract_strided_slice %31 {offsets = [1, 0], sizes = [1, 128], strides = [1, 1]} : vector<2x128xf32> to vector<1x128xf32>
    %36 = vector.broadcast %35 : vector<1x128xf32> to vector<8x128xf32>
    %37 = arith.addf %34, %36 : vector<8x128xf32>
    %38 = vector.shape_cast %37 : vector<8x128xf32> to vector<1x8x128xf32>
    %cst_13 = arith.constant dense<0.000000e+00> : vector<1x128xf32>
    %39 = vector.multi_reduction <add>, %38, %cst_13 [1] : vector<1x8x128xf32> to vector<1x128xf32>
    %40 = vector.shape_cast %39 : vector<1x128xf32> to vector<1x1x128xf32>
    %cst_14 = arith.constant 8.000000e+00 : f32
    %41 = vector.broadcast %cst_14 : f32 to vector<1x1x128xf32>
    %42 = arith.divf %40, %41 : vector<1x1x128xf32>
    %43 = vector.broadcast %42 : vector<1x1x128xf32> to vector<1x8x128xf32>
    %44 = arith.subf %38, %43 : vector<1x8x128xf32>
    %c0_15 = arith.constant 0 : index
    %c0_16 = arith.constant 0 : index
    %c0_17 = arith.constant 0 : index
    %45 = vector.load %arg5[%c0_15, %c0_16, %c0_17] : memref<1x8x128xf32, #tpu.memory_space<vmem>>, vector<1x8x128xf32>
    tpu.vector_store %arg5[%c0_15, %c0_16, %c0_17], %44 {strides = array<i32>} : memref<1x8x128xf32, #tpu.memory_space<vmem>>, vector<1x8x128xf32>,
    return
  }
  func.func @transform_0(%arg0: i32, %arg1: i32) -> (i32, i32, i32) {
    %c0_i32 = arith.constant 0 : i32
    %c0_i32_0 = arith.constant 0 : i32
    return %arg0, %c0_i32, %arg1 : i32, i32, i32
  }
  func.func @transform_1(%arg0: i32, %arg1: i32) -> (i32, i32) {
    %c0_i32 = arith.constant 0 : i32
    %c0_i32_0 = arith.constant 0 : i32
    %c0_i32_1 = arith.constant 0 : i32
    return %c0_i32, %c0_i32_0 : i32, i32
  }
  func.func @transform_2(%arg0: i32, %arg1: i32) -> (i32, i32) {
    %c0_i32 = arith.constant 0 : i32
    %c0_i32_0 = arith.constant 0 : i32
    %c0_i32_1 = arith.constant 0 : i32
    return %c0_i32, %c0_i32_0 : i32, i32
  }
  func.func @transform_3(%arg0: i32, %arg1: i32) -> (i32, i32, i32) {
    %c0_i32 = arith.constant 0 : i32
    %c0_i32_0 = arith.constant 0 : i32
    return %arg0, %c0_i32, %arg1 : i32, i32, i32
  }
}

</mosaic_0001>

<bundles_post_ra>
// kernel: tpu_custom_call.1
= control target key start
LH: loop header
LB: loop body
LE: loop exit
PB: predicated region body
PF: predicated region fallthrough
CT: control target
= control target key end

     0   :  { %8 = vsyncpa [#allocation3], 0  ;;  %s1264_s0 = inlined_call_operand.hbm [shape: f32[2,8,128], index: 0, kind: input, shape index: {}]   ;;  %s1265_s1 = inlined_call_operand.hbm [shape: bf16[128,128], index: 1, kind: input, shape index: {}]   ;;  %s1266_s2 = inlined_call_operand.vmem [shape: f32[2,128], index: 2, kind: input, shape index: {}]   ;;  %s1267_s3 = inlined_call_operand.hbm [shape: f32[2,8,128], index: 3, kind: output, shape index: {}]  }
   0x1   :  { %10 = vsyncpa [#allocation3 + $0x1], 0 }
   0x2   :  { %11 = vsyncpa [#allocation6], 0 }
   0x3   :  { %12 = vsyncpa [#allocation4], 0 }
   0x4   :  { %14 = vsyncpa [#allocation4 + $0x1], 0  ;;  %s995_s12 = smov 0   ;;  %s997_s13 = smov 0  }
   0x5   :  { %s999_s14 = smov 0   ;;  %s1001_s15 = smov 0  }
   0x6   :  { %s1003_s16 = smov 0   ;;  %s1005_s17 = smov 0  }
   0x7 LB: > { %s588_s18 = sadd.s32 4294967295, %s966_s17   ;;  %s589_s19 = sadd.s32 4294967294, %s966_s17   ;;  %s966_s17 = sphi %s1005_s17, %s20_s17   ;;  %s962_s16 = sphi %s1003_s16, %s1291_s16   ;;  %s958_s15 = sphi %s1001_s15, %s1290_s15   ;;  %s954_s14 = sphi %s999_s14, %s1289_s14   ;;  %s950_s13 = sphi %s997_s13, %s1288_s13   ;;  %s946_s12 = sphi %s995_s12, %s1287_s12  }
   0x8   : > { %p54_p0 = scmp.ne.s32.totalorder %s950_s13, %s946_s12  ;;  %p1029_p1 = scmp.eq.s32.totalorder %s588_s18, 0 }
   0x9   : > { %p1033_p2 = scmp.eq.s32.totalorder %s588_s18, 1  ;;  %p128_p3 = scmp.eq.s32.totalorder %s589_s19, 1 }
   0xa   : > { %s1272_s20 = scalar_select %p1029_p1, 1, 0 }
   0xb   : > { %s1273_s21 = scalar_select %p1033_p2, 1, 0 }
   0xc   : > { %p1039_p4 = por %p1029_p1, %p54_p0  ;;  %p590_p5 = scmp.ge.s32.totalorder %s966_s17, 1 }
   0xd   : > { %p1044_p6 = por %p128_p3, %p54_p0  ;;  %p135_p7 = scmp.lt.s32.totalorder %s966_s17, 3 }
   0xe   : > { %s1274_s22 = scalar_select %p1039_p4, 1, 0 }
   0xf   : > { %s1275_s23 = scalar_select %p1044_p6, 1, 0 }
  0x10   : > { %p1049_p8 = pnand %p590_p5, %p135_p7  ;;  %s968_s25 = smov [#allocation5]  }
  0x11   : > { %s147_s26 = sshll.u32 %s968_s25, 4  ;;  %s32_s28 = sadd.s32 1, %s962_s16  ;;  %s148_s26 = int_to_ptr.vmem [resolvable:$true] %s147_s26 }
  0x12   : > { %s1276_s24 = scalar_select %p1049_p8, 1, 0 }
  0x13   : > { %p743_p9 = pneg %p1049_p8  ;;  %s822_s4 = scalar_lea.hbm %s1265_s1, 1024 }
  0x14   : > { %p823_p12 = scmp.ne.s32.totalorder %s1265_s1, %s822_s4  ;;  %p829_p5 = scmp.lt.u32.totalorder %s822_s4, %s1265_s1 }
  0x15   : > { %p1058_p11 = pnand %p743_p9, %p1029_p1 }
  0x17   : > { %p824_p13 = pneg %p1058_p11 }
  0x19   : > { %p825_p0 = pnand %p824_p13, %p823_p12 }
  0x1b   : > { %p826_p3 = pneg %p825_p0 }
  0x1d   : > { %p831_p7 = pnand %p829_p5, %p826_p3 }
  0x1f   : > { %834 = shalt.err (!%p831_p7)
}
  0x20   : > { %s835_s9 = scalar_lea.vmem %s148_s26, 1024  ;;  %p843_p1 = scmp.lt.s32.totalorder %s148_s26, %s148_s26 }
  0x21   : > { %p836_p9 = scmp.ne.s32.totalorder %s148_s26, %s835_s9  ;;  %p844_p4 = scmp.lt.s32.totalorder %s835_s9, %s835_s9 }
  0x23   : > { %p838_p10 = pnand %p836_p9, %p824_p13  ;;  %p845_p8 = por %p844_p4, %p843_p1 }
  0x25   : > { %p839_p6 = pneg %p838_p10 }
  0x27   : > { %p846_p2 = pnand %p845_p8, %p839_p6 }
  0x29   : > { %849 = shalt.err (!%p846_p2)
}
  0x2a   : > { %s969_s10 = smov 64   ;;  %s970_s11 = smov 4  }
  0x2b   : > { %746 = dma.hbm_to_vmem [thread:$0]  (!%p1058_p11), %s1265_s1, 1024, %s148_s26, [#allocation6], %s969_s10, %s969_s10, %s970_s11  }
  0x2c   : > { %p34_p1 = scmp.ge.s32.totalorder %s32_s28, 2  ;;  %s41_s25 = sadd.s32 1, %s954_s14 }
  0x2d   : > { %p48_p2 = scmp.ne.s32.totalorder %s954_s14, %s950_s13  ;;  %p49_p4 = scmp.eq.s32.totalorder %s966_s17, 0 }
  0x2e   : > { %s1293_s28 = smov (%p34_p1, %s32_s28), 0  ;;  %p1279_p8 = scmp.ne.s32.totalorder %s1273_s21, 0 }
  0x2f   : > { %p1085_p6 = por %p49_p4, %p48_p2  ;;  %s36_s27 = ssub.s32 %s962_s16, %s1293_s28 }
  0x30   : > { %p1091_p10 = por %p1279_p8, %p48_p2  ;;  %p756_p12 = scmp.lt.s32.totalorder %s966_s17, 2 }
  0x31   : > { %p39_p11 = scmp.eq.s32.totalorder %s36_s27, 0  ;;  %s164_s26 = sand.u32 1, %s954_s14  }
  0x32   : > { %s593_s4 = sshll.u32 %s164_s26, 3  ;;  %s594_s6 = sshll.u32 %s962_s16, 7 }
  0x33   : > { %s1100_s5 = scalar_select %p39_p11, %s954_s14, %s41_s25  }
  0x34   : > { %s1106_s9 = scalar_lea.hbm %s1264_s0, %s594_s6  ;;  %s168_s21 = scalar_lea.vmem [#allocation2], %s593_s4 }
  0x35   : > { %s176_s10 = sshll.u32 %s168_s21, 4  ;;  %p1112_p13 = pnand %p756_p12, %p1085_p6  ;;  %s1108_s10 = int_to_ptr.vmem [resolvable:$true] %s176_s10 }
  0x36   : > { %s165_s18 = scalar_lea.sflag [#allocation3], %s164_s26  ;;  %s850_s19 = scalar_lea.hbm %s1106_s9, 128 }
  0x37   : > { %p851_p0 = scmp.ne.s32.totalorder %s1106_s9, %s850_s19  ;;  %p852_p3 = pneg %p1112_p13 }
  0x38   : > { %s855_s4 = scalar_lea.hbm %s1264_s0, 256  ;;  %p856_p9 = scmp.lt.u32.totalorder %s1106_s9, %s1264_s0 }
  0x39   : > { %p853_p5 = pnand %p852_p3, %p851_p0  ;;  %p857_p1 = scmp.lt.u32.totalorder %s855_s4, %s850_s19 }
  0x3a   : > { %p859_p4 = scmp.lt.u32.totalorder %s850_s19, %s1106_s9 }
  0x3b   : > { %p854_p7 = pneg %p853_p5  ;;  %p858_p2 = por %p857_p1, %p856_p9 }
  0x3d   : > { %p860_p6 = por %p859_p4, %p858_p2 }
  0x3f   : > { %p861_p8 = pnand %p860_p6, %p854_p7 }
  0x41   : > { %864 = shalt.err (!%p861_p8)
}
  0x42   : > { %s865_s26 = scalar_lea.vmem %s1108_s10, 128  ;;  %s971_s7 = smov [#allocation2]  }
  0x43   : > { %p866_p12 = scmp.ne.s32.totalorder %s1108_s10, %s865_s26  ;;  %s870_s8 = sshll.u32 %s971_s7, 4  ;;  %s871_s8 = int_to_ptr.vmem [resolvable:$false] %s870_s8 }
  0x44   : > { %s872_s21 = scalar_lea.vmem %s871_s8, 256  ;;  %p873_p5 = scmp.lt.s32.totalorder %s1108_s10, %s871_s8 }
  0x45   : > { %p868_p11 = pnand %p866_p12, %p852_p3  ;;  %p874_p9 = scmp.lt.s32.totalorder %s872_s21, %s865_s26 }
  0x47   : > { %p869_p0 = pneg %p868_p11  ;;  %p875_p1 = por %p874_p9, %p873_p5 }
  0x49   : > { %p876_p2 = pnand %p875_p1, %p869_p0 }
  0x4b   : > { %879 = shalt.err (!%p876_p2)
}
  0x4c   : > { %750 = dma.hbm_to_vmem [thread:$0]  (!%p1112_p13), %s1106_s9, 128, %s1108_s10, %s165_s18  }
  0x4d   : > { %p1282_p7 = scmp.ne.s32.totalorder %s1276_s24, 0 }
  0x4e   : > { %s1144_s19 = sand.u32 (!%p1282_p7), 1, %s950_s13   ;;  %p1283_p3 = scmp.ne.s32.totalorder (!%p1282_p7), %s1274_s22, 0 }
  0x4f   : > { %185 = sbr.rel (%p1282_p7) target bundleno = 425 (0x1a9), region = 32  ;;  %s596_s25 = sshll.u32 (!%p1282_p7), %s1144_s19, 3 }
  0x50   : > { %s188_s27 = scalar_lea.sflag (!%p1282_p7), [#allocation3], %s1144_s19  ;;  %s191_s4 = scalar_lea.vmem (!%p1282_p7), [#allocation2], %s596_s25 }
  0x56   : > { %933 = dma.done.wait (%p1283_p3), %s188_s27, 128  }
  0x57   : > { %935 = vsyncadd (%p1283_p3), %s188_s27, 4294967168  ;;  %p1284_p13 = scmp.ne.s32.totalorder %s1272_s20, 0 }
  0x59   : > { %937 = dma.done.wait (%p1284_p13), [#allocation6], 1024  }
  0x5a   : > { %939 = vsyncadd (%p1284_p13), [#allocation6], 4294966272  ;;  %v972_v0 = vmov 0.0   ;;  %vm973_vm0 = vmmov 0   ;;  %v812_v1 = vld [vmem:[#allocation5] sm:$0xff]   ;;  %v813_v2 = vld [vmem:[#allocation5 + $0x8] sm:$0xff]   ;;  %v463_v32 = vlaneseq }
  0x5b   : > { %647 = vmatprep.subr.bf16.mxu0 %v972_v0  ;;  %687 = vmatprep.subr.bf16.mxu1 %v972_v0  ;;  %v814_v3 = vld [vmem:[#allocation5 + $0x10] sm:$0xff]   ;;  %v815_v4 = vld [vmem:[#allocation5 + $0x18] sm:$0xff]   ;;  %v816_v7 = vld [vmem:[#allocation5 + $0x20] sm:$0xff]   ;;  %s608_s24 = sshll.u32 %s958_s15, 7  ;;  %s217_s9 = scalar_lea.vmem [#allocation7], %s596_s25 }
  0x5c   : > { %663 = vmatprep.mubr.msk.bf16.mxu0 %vm973_vm0, %v972_v0  ;;  %703 = vmatprep.mubr.msk.bf16.mxu1 %vm973_vm0, %v972_v0  ;;  %v1168_v5 = vld [vmem:[%s191_s4] sm:$0xff]  ;;  %v817_v10 = vld [vmem:[#allocation5 + $0x28] sm:$0xff]   ;;  %v464_v34 = vshrl.u32 %v463_v32, 7  ;;  %s498_s10 = sshll.u32 %s217_s9, 4  ;;  %s1215_s29 = scalar_lea.hbm %s1267_s3, %s608_s24  ;;  %s1217_s10 = int_to_ptr.vmem [resolvable:$true] %s498_s10 }
  0x5d   : > { %648 = vmatpush3.bf16.msra.mxu0 %v812_v1  ;;  %688 = vmatpush3.bf16.msra.mxu1 %v812_v1  ;;  %v240_v6 = vmul.f32 %v1168_v5, %v1168_v5  ;;  %v236_v8 = vpack.c.bf16 %v1168_v5, %v1168_v5  ;;  %v818_v13 = vld [vmem:[#allocation5 + $0x30] sm:$0xff]   ;;  %v819_v16 = vld [vmem:[#allocation5 + $0x38] sm:$0xff]   ;;  %s484_s6 = scalar_lea.sflag [#allocation4], %s1144_s19  ;;  %s880_s26 = scalar_lea.vmem %s1217_s10, 128 }
  0x5e   : > { %649 = vmatprep.subr.bf16.mxu0 %v972_v0  ;;  %689 = vmatprep.subr.bf16.mxu1 %v972_v0  ;;  %v465_v35 = vsub.s32 0, %v464_v34  ;;  %v462_v36 = vld [vmem:[%s1266_s2] sm:$0x3]  ;;  %v470_v37 = vsub.s32 1, %v464_v34  ;;  %p881_p4 = scmp.ne.s32.totalorder %s1217_s10, %s880_s26  ;;  %s974_s15 = smov [#allocation7]  }
  0x5f   : > { %v241_v9 = vpack.c.bf16 %v240_v6, %v240_v6  ;;  %v237_v11 = vunpack.c.l.bf16 %v236_v8  ;;  %s884_s7 = sshll.u32 %s974_s15, 4  ;;  %s885_s7 = int_to_ptr.vmem [resolvable:$false] %s884_s7 }
  0x60   : > { %v466_v39 = vrot.slane %v462_v36, %v465_v35  ;;  %v471_v42 = vrot.slane %v462_v36, %v470_v37  ;;  %p882_p6 = pnand %p881_p4, %p1091_p10  ;;  %s886_s8 = scalar_lea.vmem %s885_s7, 256 }
  0x61   : > { %650 = vmatpush3.bf16.msra.mxu0 %v813_v2  ;;  %690 = vmatpush3.bf16.msra.mxu1 %v813_v2  ;;  %v242_v12 = vunpack.c.l.bf16 %v241_v9  ;;  %v238_v14 = vsub.f32 %v1168_v5, %v237_v11  ;;  %p887_p12 = scmp.lt.s32.totalorder %s1217_s10, %s885_s7  ;;  %p888_p11 = scmp.lt.s32.totalorder %s886_s8, %s880_s26 }
  0x62   : > { %651 = vmatprep.subr.bf16.mxu0 %v972_v0  ;;  %691 = vmatprep.subr.bf16.mxu1 %v972_v0  ;;  %p883_p8 = pneg %p882_p6 }
  0x63   : > { %v243_v15 = vsub.f32 %v240_v6, %v242_v12  ;;  %v239_v17 = vpack.c.bf16 %v238_v14, %v238_v14  ;;  %p889_p0 = por %p888_p11, %p887_p12 }
  0x65   : > { %652 = vmatpush3.bf16.msra.mxu0 %v814_v3  ;;  %692 = vmatpush3.bf16.msra.mxu1 %v814_v3  ;;  %v244_v18 = vpack.c.bf16 %v243_v15, %v243_v15  ;;  %p890_p5 = pnand %p889_p0, %p883_p8 }
  0x66   : > { %653 = vmatprep.subr.bf16.mxu0 %v972_v0  ;;  %693 = vmatprep.subr.bf16.mxu1 %v972_v0 }
  0x69   : > { %654 = vmatpush3.bf16.msra.mxu0 %v815_v4  ;;  %694 = vmatpush3.bf16.msra.mxu1 %v815_v4 }
  0x6a   : > { %655 = vmatprep.subr.bf16.mxu0 %v972_v0  ;;  %695 = vmatprep.subr.bf16.mxu1 %v972_v0 }
  0x6d   : > { %656 = vmatpush3.bf16.msra.mxu0 %v816_v7  ;;  %696 = vmatpush3.bf16.msra.mxu1 %v816_v7 }
  0x6e   : > { %657 = vmatprep.subr.bf16.mxu0 %v972_v0  ;;  %697 = vmatprep.subr.bf16.mxu1 %v972_v0 }
  0x71   : > { %658 = vmatpush3.bf16.msra.mxu0 %v817_v10  ;;  %698 = vmatpush3.bf16.msra.mxu1 %v817_v10 }
  0x72   : > { %659 = vmatprep.subr.bf16.mxu0 %v972_v0  ;;  %699 = vmatprep.subr.bf16.mxu1 %v972_v0 }
  0x75   : > { %660 = vmatpush3.bf16.msra.mxu0 %v818_v13  ;;  %700 = vmatpush3.bf16.msra.mxu1 %v818_v13 }
  0x76   : > { %661 = vmatprep.subr.bf16.mxu0 %v972_v0  ;;  %701 = vmatprep.subr.bf16.mxu1 %v972_v0 }
  0x79   : > { %662 = vmatpush3.bf16.msra.mxu0 %v819_v16  ;;  %702 = vmatpush3.bf16.msra.mxu1 %v819_v16 }
  0x7a   : > { %667 = vmatprep.subr.bf16.mxu0 %v972_v0  ;;  %707 = vmatprep.subr.bf16.mxu1 %v972_v0 }
  0x7c   : > { %664 = vmatmul.mubr.bf16.vlgmr.msra.gmra.mrb[0].mxu0 %v239_v17  ;;  %704 = vmatmul.mubr.bf16.vlgmr.msra.gmra.mrb[0].mxu1 %v244_v18 }
  0x7d   : > { %668 = vmatpush3.bf16.msra.mxu0 %v812_v1  ;;  %708 = vmatpush3.bf16.msra.mxu1 %v812_v1 }
  0x7e   : > { %669 = vmatprep.subr.bf16.mxu0 %v972_v0  ;;  %709 = vmatprep.subr.bf16.mxu1 %v972_v0 }
  0x7f   : > { %683 = vmatprep.mubr.msk.bf16.mxu0 %vm973_vm0, %v972_v0  ;;  %723 = vmatprep.mubr.msk.bf16.mxu1 %vm973_vm0, %v972_v0 }
  0x81   : > { %670 = vmatpush3.bf16.msra.mxu0 %v813_v2  ;;  %710 = vmatpush3.bf16.msra.mxu1 %v813_v2 }
  0x82   : > { %671 = vmatprep.subr.bf16.mxu0 %v972_v0  ;;  %711 = vmatprep.subr.bf16.mxu1 %v972_v0 }
  0x85   : > { %672 = vmatpush3.bf16.msra.mxu0 %v814_v3  ;;  %712 = vmatpush3.bf16.msra.mxu1 %v814_v3 }
  0x86   : > { %673 = vmatprep.subr.bf16.mxu0 %v972_v0  ;;  %713 = vmatprep.subr.bf16.mxu1 %v972_v0 }
  0x89   : > { %674 = vmatpush3.bf16.msra.mxu0 %v815_v4  ;;  %714 = vmatpush3.bf16.msra.mxu1 %v815_v4 }
  0x8a   : > { %675 = vmatprep.subr.bf16.mxu0 %v972_v0  ;;  %715 = vmatprep.subr.bf16.mxu1 %v972_v0 }
  0x8d   : > { %676 = vmatpush3.bf16.msra.mxu0 %v816_v7  ;;  %716 = vmatpush3.bf16.msra.mxu1 %v816_v7 }
  0x8e   : > { %677 = vmatprep.subr.bf16.mxu0 %v972_v0  ;;  %717 = vmatprep.subr.bf16.mxu1 %v972_v0 }
  0x91   : > { %678 = vmatpush3.bf16.msra.mxu0 %v817_v10  ;;  %718 = vmatpush3.bf16.msra.mxu1 %v817_v10 }
  0x92   : > { %679 = vmatprep.subr.bf16.mxu0 %v972_v0  ;;  %719 = vmatprep.subr.bf16.mxu1 %v972_v0 }
  0x95   : > { %680 = vmatpush3.bf16.msra.mxu0 %v818_v13  ;;  %720 = vmatpush3.bf16.msra.mxu1 %v818_v13 }
  0x96   : > { %681 = vmatprep.subr.bf16.mxu0 %v972_v0  ;;  %721 = vmatprep.subr.bf16.mxu1 %v972_v0 }
  0x99   : > { %682 = vmatpush3.bf16.msra.mxu0 %v819_v16  ;;  %722 = vmatpush3.bf16.msra.mxu1 %v819_v16 }
  0x9c   : > { %684 = vmatmul.mubr.bf16.vlgmr.msra.gmra.mrb[0].mxu0 %v236_v8  ;;  %724 = vmatmul.mubr.bf16.vlgmr.msra.gmra.mrb[0].mxu1 %v241_v9 }
 0x16f   : > { %v367_v19 = vpop.f32.mrb[0].mxu0  ;;  %v447_v20 = vpop.f32.mrb[0].mxu1 }
 0x170   : > { %v453_v21 = vmul.f32 0.03125, %v367_v19  ;;  %v685_v22 = vpop.f32.mrb[1].mxu0  ;;  %v725_v23 = vpop.f32.mrb[1].mxu1  ;;  %v454_v27 = vmul.f32 0.03125, %v447_v20 }
 0x171   : > { %v370_v24 = vpop.f32.mrb[2].mxu0  ;;  %v450_v25 = vpop.f32.mrb[2].mxu1 }
 0x172   : > { %v455_v26 = vmul.f32 %v453_v21, %v453_v21  ;;  %v686_v28 = vpop.f32.mrb[3].mxu0  ;;  %v726_v29 = vpop.f32.mrb[3].mxu1  ;;  %v458_v38 = vsub.f32 %v1168_v5, %v453_v21 }
 0x174   : > { %v456_v30 = vsub.f32 %v454_v27, %v455_v26 }
 0x176   : > { %v457_v31 = vmax.f32 %v456_v30, 0.0 }
 0x178   : > { %v459_v33 = vadd.f32 1e-05, %v457_v31 }
 0x17a   : > { %820 = vrsqrt.f32 %v459_v33 }
 0x184   : > { %v821_v40 = vpop.eup %820 }
 0x185   : > { %v461_v41 = vmul.f32 %v821_v40, %v458_v38 }
 0x187   : > { %v467_v43 = vmul.f32 %v466_v39, %v461_v41 }
 0x189   : > { %v472_v44 = vadd.f32 %v471_v42, %v467_v43 }
 0x18b   : > { %v473_v45 = vrot.slane %v472_v44, 4 }
 0x18d   : > { %v474_v46 = vadd.f32 %v473_v45, %v472_v44 }
 0x18f   : > { %v475_v47 = vrot.slane %v474_v46, 2 }
 0x191   : > { %v476_v48 = vadd.f32 %v475_v47, %v474_v46 }
 0x193   : > { %v477_v49 = vrot.slane %v476_v48, 1 }
 0x195   : > { %v478_v50 = vadd.f32 %v477_v49, %v476_v48 }
 0x197   : > { %v480_v51 = vmul.f32 0.125, %v478_v50 }
 0x199   : > { %v481_v52 = vsub.f32 %v472_v44, %v480_v51 }
 0x19b   : > { %482 = vst [vmem:[%s217_s9] sm:$0xff] %v481_v52 }
 0x19c   : > { %893 = shalt.err (!%p890_p5)
}
 0x19d   : > { %s894_s21 = scalar_lea.hbm %s1215_s29, 128  ;;  %s898_s27 = scalar_lea.hbm %s1267_s3, 256 }
 0x19e   : > { %p895_p9 = scmp.ne.s32.totalorder %s1215_s29, %s894_s21  ;;  %p899_p7 = scmp.lt.u32.totalorder %s1215_s29, %s1267_s3 }
 0x19f   : > { %p900_p3 = scmp.lt.u32.totalorder %s898_s27, %s894_s21  ;;  %p902_p4 = scmp.lt.u32.totalorder %s894_s21, %s1215_s29 }
 0x1a0   : > { %p896_p1 = pnand %p895_p9, %p1091_p10 }
 0x1a1   : > { %p901_p13 = por %p900_p3, %p899_p7 }
 0x1a2   : > { %p897_p2 = pneg %p896_p1 }
 0x1a3   : > { %p903_p6 = por %p902_p4, %p901_p13 }
 0x1a5   : > { %p904_p8 = pnand %p903_p6, %p897_p2 }
 0x1a7   : > { %907 = shalt.err (!%p904_p8)
}
 0x1a8   : > { %741 = dma.vmem_to_hbm [thread:$0]  (%p1091_p10), %s1217_s10, 128, %s1215_s29, %s484_s6  }
 0x1a9 PF: > { %s510_s22 = sand.u32 1, %s946_s12   ;;  %p1285_p12 = scmp.ne.s32.totalorder %s1275_s23, 0 }
 0x1aa   : > { %p1286_p11 = scmp.ge.s32.totalorder %s966_s17, 2  ;;  %s511_s24 = scalar_lea.sflag [#allocation4], %s510_s22 }
 0x1ac   : > { %p752_p0 = pnand %p1286_p11, %p1285_p12 }
 0x1ae   : > { %941 = dma.done.wait (!%p752_p0), %s511_s24, 128  }
 0x1af   : > { %943 = vsyncadd (!%p752_p0), %s511_s24, 4294967168  ;;  %s20_s17 = sadd.s32 1, %s966_s17   ;;  %s1287_s12 = smov %s950_s13 }
 0x1b0   : > { %p17_p5 = scmp.ge.s32.totalorder %s20_s17, 4   ;;  %s1288_s13 = smov %s954_s14 }
 0x1b1   : > { %s1289_s14 = smov %s1100_s5  ;;  %s1290_s15 = smov %s962_s16 }
 0x1b2   : > { %s1291_s16 = smov %s1293_s28  ;;  %19 = sbr.rel (!%p17_p5) target bundleno = 7 (0x7), region = 81 }
 0x1b9   :  { %516 = vsyncpa [#allocation3], 1 }
 0x1ba   :  { %518 = vsyncpa [#allocation3 + $0x1], 1 }
 0x1bb   :  { %519 = vsyncpa [#allocation6], 1 }
 0x1bc   :  { %520 = vsyncpa [#allocation4], 1 }
 0x1bd   :  { %522 = vsyncpa [#allocation4 + $0x1], 1 }

</bundles_post_ra>
